<compile_context>
chip_gen: v5e
topology: v5e:2x2
jax: 0.10.0
libtpu: 0.0.40
codegen_flags: <defaults>
</compile_context>

<pallas_src>
import functools

import jax
import jax.numpy as jnp
from jax.experimental import pallas as pl
from jax.experimental.pallas import tpu as pltpu

C_OUT = 32
KH = KW = 3


def conv3x3_kernel(xflat_ref, w_ref, b_ref, o_ref, taps_ref, *, H, W):
    """3x3 'same' conv, 1 input channel -> 32 output channels, B_TILE images/step.

    xflat_ref: (B_TILE, 1, L)     flattened image, zero-padded by W+1 per side,
                                  L = H*W + 2*(W+1)
    w_ref:     (32, 9)            weights, column index = kh*3 + kw
    b_ref:     (32, 1)            bias
    o_ref:     (B_TILE, 32, H*W)  lane-dense output block
    taps_ref:  (9, H*W) f32 VMEM  scratch im2col matrix
    """
    B_TILE = o_ref.shape[0]
    HW = H * W

    w_t = w_ref[...]                       # (32, 9)
    b = b_ref[...]                         # (32, 1)

    # Column-edge masks (hoisted: computed once per grid step).  A +-1 shift in
    # the flattened layout wraps across row boundaries; those lanes must be 0.
    col = jax.lax.broadcasted_iota(jnp.int32, (1, HW), 1) % W
    not_left = col != 0                    # for kw == 0     (reads column j-1)
    not_right = col != W - 1               # for kw == KW-1  (reads column j+1)

    for n in range(B_TILE):                # static unroll over the batch tile
        # Build the (9, H*W) taps matrix with static lane shifts: tap (kh, kw)
        # of output position f = i*W + j lives at flat index f + kh*W + kw of
        # the (W+1)-zero-padded flattened image.
        for kh in range(KH):
            for kw in range(KW):
                row = xflat_ref[n, :, pl.ds(kh * W + kw, HW)]   # (1, HW)
                if kw == 0:
                    row = jnp.where(not_left, row, 0.0)
                elif kw == KW - 1:
                    row = jnp.where(not_right, row, 0.0)
                taps_ref[pl.ds(kh * KW + kw, 1), :] = row

        # (32, 9) @ (9, H*W) on the MXU, full f32 accumulation; bias folded
        # into a single epilogue add (no zeros init + extra broadcast add).
        acc = jnp.dot(w_t, taps_ref[...],
                      preferred_element_type=jnp.float32,
                      precision=jax.lax.Precision.HIGHEST)
        o_ref[n] = (acc + b).astype(o_ref.dtype)


def _pick_batch_tile(n, h, w, vmem_budget_bytes=8 << 20, max_unroll=8):
    """Largest divisor of n (<= max_unroll) whose double-buffered blocks fit."""
    hw = h * w
    l = hw + 2 * (w + 1)
    per_elem = 2 * 4 * (l + C_OUT * hw)    # 2x-buffered f32 input + output
    cap = int(max(1, min(max_unroll, vmem_budget_bytes // per_elem)))
    bt = min(n, cap)
    while n % bt:
        bt -= 1
    return bt


def conv_net_forward(x_nchw, weight_oihw, bias):
    """Forward pass equivalent to ConvNet.forward (Conv2d(1, 32, 3, 1, 1)).

    x_nchw:      (N, 1, H, W) float32
    weight_oihw: (32, 1, 3, 3) float32 (PyTorch OIHW layout)
    bias:        (32,) float32
    returns:     (N, 32, H, W) float32
    """
    N, C_in, H, W = x_nchw.shape
    assert C_in == 1
    HW = H * W
    PAD = W + 1
    L = HW + 2 * PAD

    # Glue (cheap, contiguous): flatten spatial dims and zero-pad by W+1 per
    # side so every tap becomes a static lane shift inside the kernel.
    # TODO(synk): for large H*W, fold this pad into the kernel (halo masking)
    # to avoid the extra HBM pass over the input.
    xflat = jnp.pad(x_nchw.reshape(N, 1, HW), ((0, 0), (0, 0), (PAD, PAD)))

    # Glue: OIHW (32, 1, 3, 3) -> (32, 9), column index = kh*3 + kw.
    w_t = weight_oihw.reshape(C_OUT, KH * KW)
    b = bias.reshape(C_OUT, 1)

    B_TILE = _pick_batch_tile(N, H, W)
    grid = (N // B_TILE,)

    kernel = functools.partial(conv3x3_kernel, H=H, W=W)

    flops = 2 * N * C_OUT * KH * KW * HW
    bytes_accessed = 4 * (N * L + N * C_OUT * HW + C_OUT * KH * KW + C_OUT)

    out_flat = pl.pallas_call(
        kernel,
        out_shape=jax.ShapeDtypeStruct((N, C_OUT, HW), x_nchw.dtype),
        grid_spec=pl.GridSpec(
            grid=grid,
            in_specs=[
                pl.BlockSpec((B_TILE, 1, L), lambda i: (i, 0, 0)),
                pl.BlockSpec((C_OUT, KH * KW), lambda i: (0, 0)),
                pl.BlockSpec((C_OUT, 1), lambda i: (0, 0)),
            ],
            out_specs=pl.BlockSpec((B_TILE, C_OUT, HW), lambda i: (i, 0, 0)),
            scratch_shapes=[pltpu.VMEM((KH * KW, HW), jnp.float32)],
        ),
        compiler_params=pltpu.CompilerParams(
            dimension_semantics=("parallel",),
            vmem_limit_bytes=32 * 1024 * 1024,
        ),
        cost_estimate=pl.CostEstimate(
            flops=flops, transcendentals=0, bytes_accessed=bytes_accessed),
    )(xflat, w_t, b)

    # Free, contiguous reshape back to NCHW (no transpose, no extra HBM pass).
    return out_flat.reshape(N, C_OUT, H, W)


def _reference_conv(x_nchw, weight_oihw, bias):
    # Pure-JAX reference (lax conv, full f32 precision) for correctness check.
    return jax.lax.conv_general_dilated(
        x_nchw, weight_oihw, window_strides=(1, 1), padding=((1, 1), (1, 1)),
        dimension_numbers=("NCHW", "OIHW", "NCHW"),
        precision=jax.lax.Precision.HIGHEST,
    ) + bias[None, :, None, None]


if __name__ == "__main__":
    key = jax.random.PRNGKey(0)
    kx, kw_key, kb_key = jax.random.split(key, 3)

    N, C_in, H, W = 2, 1, 16, 16
    x = jax.random.normal(kx, (N, C_in, H, W), dtype=jnp.float32)

    # Deterministic parameter init (shapes from nn.Conv2d(1, 32, 3, 1, 1)).
    fan_in = C_in * KH * KW
    bound = 1.0 / (fan_in ** 0.5)
    weight = jax.random.uniform(kw_key, (C_OUT, C_in, KH, KW),
                                minval=-bound, maxval=bound, dtype=jnp.float32)
    bias = jax.random.uniform(kb_key, (C_OUT,), minval=-bound, maxval=bound,
                              dtype=jnp.float32)

    out = conv_net_forward(x, weight, bias)
    out = jax.block_until_ready(out)

    ref = _reference_conv(x, weight, bias)
    assert out.shape == (N, C_OUT, H, W), out.shape
    # Both kernel and reference use full-f32 contraction; 1e-4 leaves margin
    # for MXU multi-pass rounding.
    assert jnp.allclose(out, ref, atol=1e-4, rtol=1e-4), (
        float(jnp.max(jnp.abs(out - ref))))

    print("KERNEL_OK")
</pallas_src>

<mosaic_0001>
module attributes {stable_mosaic.version = 11 : i64} {
  func.func @conv3x3_kernel(%arg0: i32, %arg1: memref<2x1x290xf32, #tpu.memory_space<vmem>>, %arg2: memref<32x9xf32, #tpu.memory_space<vmem>>, %arg3: memref<32x1xf32, #tpu.memory_space<vmem>>, %arg4: memref<2x32x256xf32, #tpu.memory_space<vmem>>, %arg5: memref<9x256xf32, #tpu.memory_space<vmem>>) attributes {dimension_semantics = [#tpu.dimension_semantics<parallel>], iteration_bounds = array<i64: 1>, scalar_prefetch = 0 : i64, scratch_operands = 1 : i64, tpu.core_type = #tpu.core_type<tc>, window_params = [{transform_indices = @transform_0, window_bounds = array<i64: 2, 1, 290>}, {pipeline_mode = #tpu.pipeline_mode<synchronous>, transform_indices = @transform_1, window_bounds = array<i64: 32, 9>}, {pipeline_mode = #tpu.pipeline_mode<synchronous>, transform_indices = @transform_2, window_bounds = array<i64: 32, 1>}, {transform_indices = @transform_3, window_bounds = array<i64: 2, 32, 256>}]} {
    %c0 = arith.constant 0 : index
    %c0_0 = arith.constant 0 : index
    %0 = vector.load %arg2[%c0, %c0_0] : memref<32x9xf32, #tpu.memory_space<vmem>>, vector<32x9xf32>
    %c0_1 = arith.constant 0 : index
    %c0_2 = arith.constant 0 : index
    %1 = vector.load %arg3[%c0_1, %c0_2] : memref<32x1xf32, #tpu.memory_space<vmem>>, vector<32x1xf32>
    %2 = tpu.iota {dimensions = array<i32: 1>} : vector<1x256xi32>
    %c16_i32 = arith.constant 16 : i32
    %c0_i32 = arith.constant 0 : i32
    %3 = arith.cmpi eq, %c16_i32, %c0_i32 : i32
    %c1_i32 = arith.constant 1 : i32
    %4 = arith.select %3, %c1_i32, %c16_i32 : i32
    %5 = vector.broadcast %4 : i32 to vector<1x256xi32>
    %6 = arith.remsi %2, %5 : vector<1x256xi32>
    %c0_i32_3 = arith.constant 0 : i32
    %7 = vector.broadcast %c0_i32_3 : i32 to vector<1x256xi32>
    %8 = arith.cmpi ne, %6, %7 : vector<1x256xi32>
    %c0_i32_4 = arith.constant 0 : i32
    %9 = vector.broadcast %c0_i32_4 : i32 to vector<1x256xi32>
    %10 = arith.cmpi slt, %6, %9 : vector<1x256xi32>
    %c0_i32_5 = arith.constant 0 : i32
    %11 = arith.cmpi slt, %4, %c0_i32_5 : i32
    %12 = vector.broadcast %11 : i1 to vector<1x256xi1>
    %13 = vector.broadcast %12 : vector<1x256xi1> to vector<1x256xi1>
    %14 = arith.xori %10, %13 : vector<1x256xi1>
    %15 = arith.andi %14, %8 : vector<1x256xi1>
    %16 = vector.broadcast %4 : i32 to vector<1x256xi32>
    %17 = arith.addi %6, %16 : vector<1x256xi32>
    %18 = arith.select %15, %17, %6 : vector<1x256xi1>, vector<1x256xi32>
    %c0_i32_6 = arith.constant 0 : i32
    %19 = vector.broadcast %c0_i32_6 : i32 to vector<1x256xi32>
    %20 = arith.cmpi ne, %18, %19 : vector<1x256xi32>
    %c15_i32 = arith.constant 15 : i32
    %21 = vector.broadcast %c15_i32 : i32 to vector<1x256xi32>
    %22 = arith.cmpi ne, %18, %21 : vector<1x256xi32>
    %c0_7 = arith.constant 0 : index
    %c0_8 = arith.constant 0 : index
    %c0_9 = arith.constant 0 : index
    %23 = vector.load %arg1[%c0_7, %c0_8, %c0_9] : memref<2x1x290xf32, #tpu.memory_space<vmem>>, vector<1x1x256xf32>
    %24 = vector.shape_cast %23 : vector<1x1x256xf32> to vector<1x256xf32>
    %cst = arith.constant 0.000000e+00 : f32
    %25 = vector.broadcast %cst : f32 to vector<1x256xf32>
    %26 = arith.select %20, %24, %25 : vector<1x256xi1>, vector<1x256xf32>
    %c0_10 = arith.constant 0 : index
    %c0_11 = arith.constant 0 : index
    %27 = vector.load %arg5[%c0_10, %c0_11] : memref<9x256xf32, #tpu.memory_space<vmem>>, vector<1x256xf32>
    tpu.vector_store %arg5[%c0_10, %c0_11], %26 {strides = array<i32>} : memref<9x256xf32, #tpu.memory_space<vmem>>, vector<1x256xf32>,
    %c0_12 = arith.constant 0 : index
    %c0_13 = arith.constant 0 : index
    %c1 = arith.constant 1 : index
    %28 = vector.load %arg1[%c0_12, %c0_13, %c1] : memref<2x1x290xf32, #tpu.memory_space<vmem>>, vector<1x1x256xf32>
    %29 = vector.shape_cast %28 : vector<1x1x256xf32> to vector<1x256xf32>
    %c1_14 = arith.constant 1 : index
    %c0_15 = arith.constant 0 : index
    %30 = vector.load %arg5[%c1_14, %c0_15] : memref<9x256xf32, #tpu.memory_space<vmem>>, vector<1x256xf32>
    tpu.vector_store %arg5[%c1_14, %c0_15], %29 {strides = array<i32>} : memref<9x256xf32, #tpu.memory_space<vmem>>, vector<1x256xf32>,
    %c0_16 = arith.constant 0 : index
    %c0_17 = arith.constant 0 : index
    %c2 = arith.constant 2 : index
    %31 = vector.load %arg1[%c0_16, %c0_17, %c2] : memref<2x1x290xf32, #tpu.memory_space<vmem>>, vector<1x1x256xf32>
    %32 = vector.shape_cast %31 : vector<1x1x256xf32> to vector<1x256xf32>
    %cst_18 = arith.constant 0.000000e+00 : f32
    %33 = vector.broadcast %cst_18 : f32 to vector<1x256xf32>
    %34 = arith.select %22, %32, %33 : vector<1x256xi1>, vector<1x256xf32>
    %c2_19 = arith.constant 2 : index
    %c0_20 = arith.constant 0 : index
    %35 = vector.load %arg5[%c2_19, %c0_20] : memref<9x256xf32, #tpu.memory_space<vmem>>, vector<1x256xf32>
    tpu.vector_store %arg5[%c2_19, %c0_20], %34 {strides = array<i32>} : memref<9x256xf32, #tpu.memory_space<vmem>>, vector<1x256xf32>,
    %c0_21 = arith.constant 0 : index
    %c0_22 = arith.constant 0 : index
    %c16 = arith.constant 16 : index
    %36 = vector.load %arg1[%c0_21, %c0_22, %c16] : memref<2x1x290xf32, #tpu.memory_space<vmem>>, vector<1x1x256xf32>
    %37 = vector.shape_cast %36 : vector<1x1x256xf32> to vector<1x256xf32>
    %cst_23 = arith.constant 0.000000e+00 : f32
    %38 = vector.broadcast %cst_23 : f32 to vector<1x256xf32>
    %39 = arith.select %20, %37, %38 : vector<1x256xi1>, vector<1x256xf32>
    %c3 = arith.constant 3 : index
    %c0_24 = arith.constant 0 : index
    %40 = vector.load %arg5[%c3, %c0_24] : memref<9x256xf32, #tpu.memory_space<vmem>>, vector<1x256xf32>
    tpu.vector_store %arg5[%c3, %c0_24], %39 {strides = array<i32>} : memref<9x256xf32, #tpu.memory_space<vmem>>, vector<1x256xf32>,
    %c0_25 = arith.constant 0 : index
    %c0_26 = arith.constant 0 : index
    %c17 = arith.constant 17 : index
    %41 = vector.load %arg1[%c0_25, %c0_26, %c17] : memref<2x1x290xf32, #tpu.memory_space<vmem>>, vector<1x1x256xf32>
    %42 = vector.shape_cast %41 : vector<1x1x256xf32> to vector<1x256xf32>
    %c4 = arith.constant 4 : index
    %c0_27 = arith.constant 0 : index
    %43 = vector.load %arg5[%c4, %c0_27] : memref<9x256xf32, #tpu.memory_space<vmem>>, vector<1x256xf32>
    tpu.vector_store %arg5[%c4, %c0_27], %42 {strides = array<i32>} : memref<9x256xf32, #tpu.memory_space<vmem>>, vector<1x256xf32>,
    %c0_28 = arith.constant 0 : index
    %c0_29 = arith.constant 0 : index
    %c18 = arith.constant 18 : index
    %44 = vector.load %arg1[%c0_28, %c0_29, %c18] : memref<2x1x290xf32, #tpu.memory_space<vmem>>, vector<1x1x256xf32>
    %45 = vector.shape_cast %44 : vector<1x1x256xf32> to vector<1x256xf32>
    %cst_30 = arith.constant 0.000000e+00 : f32
    %46 = vector.broadcast %cst_30 : f32 to vector<1x256xf32>
    %47 = arith.select %22, %45, %46 : vector<1x256xi1>, vector<1x256xf32>
    %c5 = arith.constant 5 : index
    %c0_31 = arith.constant 0 : index
    %48 = vector.load %arg5[%c5, %c0_31] : memref<9x256xf32, #tpu.memory_space<vmem>>, vector<1x256xf32>
    tpu.vector_store %arg5[%c5, %c0_31], %47 {strides = array<i32>} : memref<9x256xf32, #tpu.memory_space<vmem>>, vector<1x256xf32>,
    %c0_32 = arith.constant 0 : index
    %c0_33 = arith.constant 0 : index
    %c32 = arith.constant 32 : index
    %49 = vector.load %arg1[%c0_32, %c0_33, %c32] : memref<2x1x290xf32, #tpu.memory_space<vmem>>, vector<1x1x256xf32>
    %50 = vector.shape_cast %49 : vector<1x1x256xf32> to vector<1x256xf32>
    %cst_34 = arith.constant 0.000000e+00 : f32
    %51 = vector.broadcast %cst_34 : f32 to vector<1x256xf32>
    %52 = arith.select %20, %50, %51 : vector<1x256xi1>, vector<1x256xf32>
    %c6 = arith.constant 6 : index
    %c0_35 = arith.constant 0 : index
    %53 = vector.load %arg5[%c6, %c0_35] : memref<9x256xf32, #tpu.memory_space<vmem>>, vector<1x256xf32>
    tpu.vector_store %arg5[%c6, %c0_35], %52 {strides = array<i32>} : memref<9x256xf32, #tpu.memory_space<vmem>>, vector<1x256xf32>,
    %c0_36 = arith.constant 0 : index
    %c0_37 = arith.constant 0 : index
    %c33 = arith.constant 33 : index
    %54 = vector.load %arg1[%c0_36, %c0_37, %c33] : memref<2x1x290xf32, #tpu.memory_space<vmem>>, vector<1x1x256xf32>
    %55 = vector.shape_cast %54 : vector<1x1x256xf32> to vector<1x256xf32>
    %c7 = arith.constant 7 : index
    %c0_38 = arith.constant 0 : index
    %56 = vector.load %arg5[%c7, %c0_38] : memref<9x256xf32, #tpu.memory_space<vmem>>, vector<1x256xf32>
    tpu.vector_store %arg5[%c7, %c0_38], %55 {strides = array<i32>} : memref<9x256xf32, #tpu.memory_space<vmem>>, vector<1x256xf32>,
    %c0_39 = arith.constant 0 : index
    %c0_40 = arith.constant 0 : index
    %c34 = arith.constant 34 : index
    %57 = vector.load %arg1[%c0_39, %c0_40, %c34] : memref<2x1x290xf32, #tpu.memory_space<vmem>>, vector<1x1x256xf32>
    %58 = vector.shape_cast %57 : vector<1x1x256xf32> to vector<1x256xf32>
    %cst_41 = arith.constant 0.000000e+00 : f32
    %59 = vector.broadcast %cst_41 : f32 to vector<1x256xf32>
    %60 = arith.select %22, %58, %59 : vector<1x256xi1>, vector<1x256xf32>
    %c8 = arith.constant 8 : index
    %c0_42 = arith.constant 0 : index
    %61 = vector.load %arg5[%c8, %c0_42] : memref<9x256xf32, #tpu.memory_space<vmem>>, vector<1x256xf32>
    tpu.vector_store %arg5[%c8, %c0_42], %60 {strides = array<i32>} : memref<9x256xf32, #tpu.memory_space<vmem>>, vector<1x256xf32>,
    %c0_43 = arith.constant 0 : index
    %c0_44 = arith.constant 0 : index
    %62 = vector.load %arg5[%c0_43, %c0_44] : memref<9x256xf32, #tpu.memory_space<vmem>>, vector<9x256xf32>
    %cst_45 = arith.constant dense<0.000000e+00> : vector<32x256xf32>
    %63 = tpu.matmul %0, %62, %cst_45 {dimension_numbers = #tpu.dot_dimension_numbers<[1], [0], [0], [1], [0, 0, 1, 1], [], []>, precision = #tpu.contract_precision<fp32>} : vector<32x9xf32>, vector<9x256xf32>, vector<32x256xf32> -> vector<32x256xf32>
    %64 = vector.broadcast %1 : vector<32x1xf32> to vector<32x256xf32>
    %65 = arith.addf %63, %64 : vector<32x256xf32>
    %c0_46 = arith.constant 0 : index
    %c0_47 = arith.constant 0 : index
    %c0_48 = arith.constant 0 : index
    %66 = vector.load %arg4[%c0_46, %c0_47, %c0_48] : memref<2x32x256xf32, #tpu.memory_space<vmem>>, vector<1x32x256xf32>
    %67 = vector.shape_cast %66 : vector<1x32x256xf32> to vector<32x256xf32>
    %68 = vector.shape_cast %65 : vector<32x256xf32> to vector<1x32x256xf32>
    tpu.vector_store %arg4[%c0_46, %c0_47, %c0_48], %68 {strides = array<i32>} : memref<2x32x256xf32, #tpu.memory_space<vmem>>, vector<1x32x256xf32>,
    %c1_49 = arith.constant 1 : index
    %c0_50 = arith.constant 0 : index
    %c0_51 = arith.constant 0 : index
    %69 = vector.load %arg1[%c1_49, %c0_50, %c0_51] : memref<2x1x290xf32, #tpu.memory_space<vmem>>, vector<1x1x256xf32>
    %70 = vector.shape_cast %69 : vector<1x1x256xf32> to vector<1x256xf32>
    %cst_52 = arith.constant 0.000000e+00 : f32
    %71 = vector.broadcast %cst_52 : f32 to vector<1x256xf32>
    %72 = arith.select %20, %70, %71 : vector<1x256xi1>, vector<1x256xf32>
    %c0_53 = arith.constant 0 : index
    %c0_54 = arith.constant 0 : index
    %73 = vector.load %arg5[%c0_53, %c0_54] : memref<9x256xf32, #tpu.memory_space<vmem>>, vector<1x256xf32>
    tpu.vector_store %arg5[%c0_53, %c0_54], %72 {strides = array<i32>} : memref<9x256xf32, #tpu.memory_space<vmem>>, vector<1x256xf32>,
    %c1_55 = arith.constant 1 : index
    %c0_56 = arith.constant 0 : index
    %c1_57 = arith.constant 1 : index
    %74 = vector.load %arg1[%c1_55, %c0_56, %c1_57] : memref<2x1x290xf32, #tpu.memory_space<vmem>>, vector<1x1x256xf32>
    %75 = vector.shape_cast %74 : vector<1x1x256xf32> to vector<1x256xf32>
    %c1_58 = arith.constant 1 : index
    %c0_59 = arith.constant 0 : index
    %76 = vector.load %arg5[%c1_58, %c0_59] : memref<9x256xf32, #tpu.memory_space<vmem>>, vector<1x256xf32>
    tpu.vector_store %arg5[%c1_58, %c0_59], %75 {strides = array<i32>} : memref<9x256xf32, #tpu.memory_space<vmem>>, vector<1x256xf32>,
    %c1_60 = arith.constant 1 : index
    %c0_61 = arith.constant 0 : index
    %c2_62 = arith.constant 2 : index
    %77 = vector.load %arg1[%c1_60, %c0_61, %c2_62] : memref<2x1x290xf32, #tpu.memory_space<vmem>>, vector<1x1x256xf32>
    %78 = vector.shape_cast %77 : vector<1x1x256xf32> to vector<1x256xf32>
    %cst_63 = arith.constant 0.000000e+00 : f32
    %79 = vector.broadcast %cst_63 : f32 to vector<1x256xf32>
    %80 = arith.select %22, %78, %79 : vector<1x256xi1>, vector<1x256xf32>
    %c2_64 = arith.constant 2 : index
    %c0_65 = arith.constant 0 : index
    %81 = vector.load %arg5[%c2_64, %c0_65] : memref<9x256xf32, #tpu.memory_space<vmem>>, vector<1x256xf32>
    tpu.vector_store %arg5[%c2_64, %c0_65], %80 {strides = array<i32>} : memref<9x256xf32, #tpu.memory_space<vmem>>, vector<1x256xf32>,
    %c1_66 = arith.constant 1 : index
    %c0_67 = arith.constant 0 : index
    %c16_68 = arith.constant 16 : index
    %82 = vector.load %arg1[%c1_66, %c0_67, %c16_68] : memref<2x1x290xf32, #tpu.memory_space<vmem>>, vector<1x1x256xf32>
    %83 = vector.shape_cast %82 : vector<1x1x256xf32> to vector<1x256xf32>
    %cst_69 = arith.constant 0.000000e+00 : f32
    %84 = vector.broadcast %cst_69 : f32 to vector<1x256xf32>
    %85 = arith.select %20, %83, %84 : vector<1x256xi1>, vector<1x256xf32>
    %c3_70 = arith.constant 3 : index
    %c0_71 = arith.constant 0 : index
    %86 = vector.load %arg5[%c3_70, %c0_71] : memref<9x256xf32, #tpu.memory_space<vmem>>, vector<1x256xf32>
    tpu.vector_store %arg5[%c3_70, %c0_71], %85 {strides = array<i32>} : memref<9x256xf32, #tpu.memory_space<vmem>>, vector<1x256xf32>,
    %c1_72 = arith.constant 1 : index
    %c0_73 = arith.constant 0 : index
    %c17_74 = arith.constant 17 : index
    %87 = vector.load %arg1[%c1_72, %c0_73, %c17_74] : memref<2x1x290xf32, #tpu.memory_space<vmem>>, vector<1x1x256xf32>
    %88 = vector.shape_cast %87 : vector<1x1x256xf32> to vector<1x256xf32>
    %c4_75 = arith.constant 4 : index
    %c0_76 = arith.constant 0 : index
    %89 = vector.load %arg5[%c4_75, %c0_76] : memref<9x256xf32, #tpu.memory_space<vmem>>, vector<1x256xf32>
    tpu.vector_store %arg5[%c4_75, %c0_76], %88 {strides = array<i32>} : memref<9x256xf32, #tpu.memory_space<vmem>>, vector<1x256xf32>,
    %c1_77 = arith.constant 1 : index
    %c0_78 = arith.constant 0 : index
    %c18_79 = arith.constant 18 : index
    %90 = vector.load %arg1[%c1_77, %c0_78, %c18_79] : memref<2x1x290xf32, #tpu.memory_space<vmem>>, vector<1x1x256xf32>
    %91 = vector.shape_cast %90 : vector<1x1x256xf32> to vector<1x256xf32>
    %cst_80 = arith.constant 0.000000e+00 : f32
    %92 = vector.broadcast %cst_80 : f32 to vector<1x256xf32>
    %93 = arith.select %22, %91, %92 : vector<1x256xi1>, vector<1x256xf32>
    %c5_81 = arith.constant 5 : index
    %c0_82 = arith.constant 0 : index
    %94 = vector.load %arg5[%c5_81, %c0_82] : memref<9x256xf32, #tpu.memory_space<vmem>>, vector<1x256xf32>
    tpu.vector_store %arg5[%c5_81, %c0_82], %93 {strides = array<i32>} : memref<9x256xf32, #tpu.memory_space<vmem>>, vector<1x256xf32>,
    %c1_83 = arith.constant 1 : index
    %c0_84 = arith.constant 0 : index
    %c32_85 = arith.constant 32 : index
    %95 = vector.load %arg1[%c1_83, %c0_84, %c32_85] : memref<2x1x290xf32, #tpu.memory_space<vmem>>, vector<1x1x256xf32>
    %96 = vector.shape_cast %95 : vector<1x1x256xf32> to vector<1x256xf32>
    %cst_86 = arith.constant 0.000000e+00 : f32
    %97 = vector.broadcast %cst_86 : f32 to vector<1x256xf32>
    %98 = arith.select %20, %96, %97 : vector<1x256xi1>, vector<1x256xf32>
    %c6_87 = arith.constant 6 : index
    %c0_88 = arith.constant 0 : index
    %99 = vector.load %arg5[%c6_87, %c0_88] : memref<9x256xf32, #tpu.memory_space<vmem>>, vector<1x256xf32>
    tpu.vector_store %arg5[%c6_87, %c0_88], %98 {strides = array<i32>} : memref<9x256xf32, #tpu.memory_space<vmem>>, vector<1x256xf32>,
    %c1_89 = arith.constant 1 : index
    %c0_90 = arith.constant 0 : index
    %c33_91 = arith.constant 33 : index
    %100 = vector.load %arg1[%c1_89, %c0_90, %c33_91] : memref<2x1x290xf32, #tpu.memory_space<vmem>>, vector<1x1x256xf32>
    %101 = vector.shape_cast %100 : vector<1x1x256xf32> to vector<1x256xf32>
    %c7_92 = arith.constant 7 : index
    %c0_93 = arith.constant 0 : index
    %102 = vector.load %arg5[%c7_92, %c0_93] : memref<9x256xf32, #tpu.memory_space<vmem>>, vector<1x256xf32>
    tpu.vector_store %arg5[%c7_92, %c0_93], %101 {strides = array<i32>} : memref<9x256xf32, #tpu.memory_space<vmem>>, vector<1x256xf32>,
    %c1_94 = arith.constant 1 : index
    %c0_95 = arith.constant 0 : index
    %c34_96 = arith.constant 34 : index
    %103 = vector.load %arg1[%c1_94, %c0_95, %c34_96] : memref<2x1x290xf32, #tpu.memory_space<vmem>>, vector<1x1x256xf32>
    %104 = vector.shape_cast %103 : vector<1x1x256xf32> to vector<1x256xf32>
    %cst_97 = arith.constant 0.000000e+00 : f32
    %105 = vector.broadcast %cst_97 : f32 to vector<1x256xf32>
    %106 = arith.select %22, %104, %105 : vector<1x256xi1>, vector<1x256xf32>
    %c8_98 = arith.constant 8 : index
    %c0_99 = arith.constant 0 : index
    %107 = vector.load %arg5[%c8_98, %c0_99] : memref<9x256xf32, #tpu.memory_space<vmem>>, vector<1x256xf32>
    tpu.vector_store %arg5[%c8_98, %c0_99], %106 {strides = array<i32>} : memref<9x256xf32, #tpu.memory_space<vmem>>, vector<1x256xf32>,
    %c0_100 = arith.constant 0 : index
    %c0_101 = arith.constant 0 : index
    %108 = vector.load %arg5[%c0_100, %c0_101] : memref<9x256xf32, #tpu.memory_space<vmem>>, vector<9x256xf32>
    %cst_102 = arith.constant dense<0.000000e+00> : vector<32x256xf32>
    %109 = tpu.matmul %0, %108, %cst_102 {dimension_numbers = #tpu.dot_dimension_numbers<[1], [0], [0], [1], [0, 0, 1, 1], [], []>, precision = #tpu.contract_precision<fp32>} : vector<32x9xf32>, vector<9x256xf32>, vector<32x256xf32> -> vector<32x256xf32>
    %110 = vector.broadcast %1 : vector<32x1xf32> to vector<32x256xf32>
    %111 = arith.addf %109, %110 : vector<32x256xf32>
    %c1_103 = arith.constant 1 : index
    %c0_104 = arith.constant 0 : index
    %c0_105 = arith.constant 0 : index
    %112 = vector.load %arg4[%c1_103, %c0_104, %c0_105] : memref<2x32x256xf32, #tpu.memory_space<vmem>>, vector<1x32x256xf32>
    %113 = vector.shape_cast %112 : vector<1x32x256xf32> to vector<32x256xf32>
    %114 = vector.shape_cast %111 : vector<32x256xf32> to vector<1x32x256xf32>
    tpu.vector_store %arg4[%c1_103, %c0_104, %c0_105], %114 {strides = array<i32>} : memref<2x32x256xf32, #tpu.memory_space<vmem>>, vector<1x32x256xf32>,
    return
  }
  func.func @transform_0(%arg0: i32) -> (i32, i32, i32) {
    %c0_i32 = arith.constant 0 : i32
    %c0_i32_0 = arith.constant 0 : i32
    %c0_i32_1 = arith.constant 0 : i32
    return %arg0, %c0_i32, %c0_i32_0 : i32, i32, i32
  }
  func.func @transform_1(%arg0: i32) -> (i32, i32) {
    %c0_i32 = arith.constant 0 : i32
    %c0_i32_0 = arith.constant 0 : i32
    %c0_i32_1 = arith.constant 0 : i32
    return %c0_i32, %c0_i32_0 : i32, i32
  }
  func.func @transform_2(%arg0: i32) -> (i32, i32) {
    %c0_i32 = arith.constant 0 : i32
    %c0_i32_0 = arith.constant 0 : i32
    %c0_i32_1 = arith.constant 0 : i32
    return %c0_i32, %c0_i32_0 : i32, i32
  }
  func.func @transform_3(%arg0: i32) -> (i32, i32, i32) {
    %c0_i32 = arith.constant 0 : i32
    %c0_i32_0 = arith.constant 0 : i32
    %c0_i32_1 = arith.constant 0 : i32
    return %arg0, %c0_i32, %c0_i32_0 : i32, i32, i32
  }
}

</mosaic_0001>

<bundles_post_ra>
// kernel: tpu_custom_call.1
= control target key start
LH: loop header
LB: loop body
LE: loop exit
PB: predicated region body
PF: predicated region fallthrough
CT: control target
= control target key end

     0   :  { %s1546_s16 = smov 94   ;;  %s1547_s17 = smov 126   ;;  %s2092_s0 = inlined_call_operand.vmem [shape: f32[2,1,290], index: 0, kind: input, shape index: {}]   ;;  %s2093_s1 = inlined_call_operand.vmem [shape: f32[32,9], index: 1, kind: input, shape index: {}]   ;;  %s2094_s2 = inlined_call_operand.vmem [shape: f32[32,1], index: 2, kind: input, shape index: {}]   ;;  %s2095_s3 = inlined_call_operand.hbm [shape: f32[2,32,256], index: 3, kind: output, shape index: {}]  }
   0x1   :  { %v211_v0 = vld [vmem:[%s2092_s0] sm:$0x7] }
   0x2   :  { %v214_v1 = vperm.slane %v211_v0, 1  ;;  %v213_v2 = vperm.slane %v211_v0, 0  ;;  %v85_v3 = vld [vmem:[%s2092_s0] sm:$0x7] }
   0x3   :  { %v89_v4 = vperm.slane %v85_v3, 2 }
   0x4   :  { %218 = vrot.lane.b32.xlu0 %v214_v1, %s1546_s16  ;;  %216 = vrot.lane.b32.xlu1 %v213_v2, %s1546_s16 }
   0x5   :  { %94 = vrot.lane.b32.xlu2 %v89_v4, %s1547_s17 }
   0x6   :  { %8 = vsyncpa [#allocation4], 0  ;;  %v215_v5 = vperm.slane %v211_v0, 2  ;;  %v88_v6 = vperm.slane %v85_v3, 1  ;;  %v111_v7 = vld [vmem:[%s2092_s0] sm:$0x7]  ;;  %v23_v47 = vlaneseq }
   0x7   :  { %v114_v8 = vperm.slane %v111_v7, 1  ;;  %v148_v9 = vld [vmem:[%s2092_s0] sm:$0x7]  ;;  %s1548_s22 = smov 112   ;;  %v115_v10 = vperm.slane %v111_v7, 2  ;;  %s1549_s23 = smov 110  }
   0x8   :  { %v151_v11 = vperm.slane %v148_v9, 1  ;;  %v152_v12 = vperm.slane %v148_v9, 2  ;;  %v174_v13 = vld [vmem:[%s2092_s0] sm:$0x7]  ;;  %s1550_s28 = smov 96   ;;  %s1551_s29 = smov 127  }
   0x9   :  { %v177_v14 = vperm.slane %v174_v13, 1  ;;  %v178_v15 = vperm.slane %v174_v13, 2  ;;  %v74_v16 = vld [vmem:[%s2092_s0] sm:$0x7]  ;;  %v113_v17 = vperm.slane %v111_v7, 0  ;;  %v87_v18 = vperm.slane %v85_v3, 0 }
   0xa   :  { %v137_v19 = vld [vmem:[%s2092_s0] sm:$0x7]  ;;  %s1552_s5 = smov 111   ;;  %v176_v20 = vperm.slane %v174_v13, 0  ;;  %v150_v21 = vperm.slane %v148_v9, 0  ;;  %s1553_s10 = smov 95  }
   0xb   :  { %v200_v22 = vld [vmem:[%s2092_s0] sm:$0x7]  ;;  %v1504_v23 = vld [vmem:[%s2092_s0 + $0x3] sm:$0x7]  ;;  %v24_v49 = vand.u32 127, %v23_v47  ;;  %vm79_vm1 = vcmask 1039360  }
   0xc   :  { %220 = vrot.lane.b32.xlu0 %v215_v5, %s1546_s16  ;;  %92 = vrot.lane.b32.xlu1 %v88_v6, %s1547_s17  ;;  %v935_v24 = vperm.slane %v1504_v23, 2  ;;  %v934_v25 = vperm.slane %v1504_v23, 1  ;;  %v933_v26 = vperm.slane %v1504_v23, 0  ;;  %v1498_v27 = vld [vmem:[%s2092_s0 + $0x3] sm:$0x7]  ;;  %vm65_vm3 = vcmask 1040384  }
   0xd   :  { %118 = vrot.lane.b32.xlu2 %v114_v8, %s1548_s22  ;;  %v821_v28 = vperm.slane %v1498_v27, 2  ;;  %v820_v29 = vperm.slane %v1498_v27, 1  ;;  %v1499_v30 = vld [vmem:[%s2092_s0 + $0x3] sm:$0x7]  ;;  %v819_v41 = vperm.slane %v1498_v27, 0  ;;  %v25_v50 = vadd.s32 128, %v24_v49 }
   0xe   :  { %v844_v31 = vperm.slane %v1499_v30, 1  ;;  %v1501_v32 = vld [vmem:[%s2092_s0 + $0x3] sm:$0x7]  ;;  %v845_v34 = vperm.slane %v1499_v30, 2  ;;  %v843_v40 = vperm.slane %v1499_v30, 0  ;;  %v30_v57 = vand.u32 15, %v24_v49 }
   0xf   :  { %v877_v33 = vperm.slane %v1501_v32, 1  ;;  %v878_v35 = vperm.slane %v1501_v32, 2  ;;  %v1502_v36 = vld [vmem:[%s2092_s0 + $0x3] sm:$0x7]  ;;  %v876_v44 = vperm.slane %v1501_v32, 0  ;;  %v37_v53 = vand.u32 15, %v25_v50 }
  0x10   :  { %v902_v37 = vperm.slane %v1502_v36, 2  ;;  %v901_v38 = vperm.slane %v1502_v36, 1  ;;  %v1497_v39 = vld [vmem:[%s2092_s0 + $0x3] sm:$0x7]  ;;  %v900_v43 = vperm.slane %v1502_v36, 0  ;;  %vm1677_vm2 = vcmp.ne.s32.totalorder %v30_v57, 0 }
  0x11   :  { %v1500_v42 = vld [vmem:[%s2092_s0 + $0x3] sm:$0x7]  ;;  %v54_v51 = vld [vmem:[%s2092_s0] sm:$0x3]  ;;  %vm1671_vm0 = vcmp.ne.s32.totalorder %v37_v53, 0  ;;  %vm1683_vm4 = vcmp.lt.s32.totalorder %v23_v47, 256 }
  0x12   :  { %v1503_v45 = vld [vmem:[%s2092_s0 + $0x3] sm:$0x7]  ;;  %v57_v52 = vperm.slane %v54_v51, 1  ;;  %v56_v61 = vperm.slane %v54_v51, 0  ;;  %vm222_vm5 = vcmask 769024   ;;  %vm1693_vm6 = vcmp.ne.s32.totalorder %v37_v53, 15 }
  0x13   :  { %vm1697_vm7 = vcmp.ne.s32.totalorder %v30_v57, 15  ;;  %vm142_vm8 = vcmask 908288   ;;  %vm205_vm9 = vcmask 777216   ;;  %vm96_vm10 = vcmask 1031168   ;;  %v15_v36 = vld [vmem:[%s2093_s1] sm:$0xff]  ;;  %s1484_s20 = sshll.u32 %s2095_s3, 4  ;;  %s1485_s20 = int_to_ptr.hbm [resolvable:$true] %s1484_s20 }
  0x14   :  { %120 = vrot.lane.b32.xlu0 %v115_v10, %s1548_s22  ;;  %155 = vrot.lane.b32.xlu1 %v151_v11, %s1549_s23  ;;  %v61_v56 = vsel %vm1671_vm0, %v57_v52, 0.0  ;;  %v60_v1 = vsel %vm1677_vm2, %v56_v61, 0.0  ;;  %vm122_vm11 = vcmask 916480   ;;  %vm261_vm12 = vcmask 72704   ;;  %s1556_s21 = smov 256   ;;  %s1557_s24 = smov 16  }
  0x15   :  { %157 = vrot.lane.b32.xlu2 %v152_v12, %s1549_s23  ;;  %v64_v58 = vrot.slane %v61_v56, 7  ;;  %vm159_vm13 = vcmask 900096   ;;  %vm185_vm14 = vcmask 785408  }
  0x17   :  { %v66_v3 = vsel %vm65_vm3, %v60_v1, %v64_v58 }
  0x18   :  { %72 = vst.msk [vmem:[#allocation2] ss:$8 sm:$0x3] %vm1683_vm4, %v66_v3 }
  0x1c   :  { %181 = vrot.lane.b32.xlu0 %v177_v14, %s1550_s28  ;;  %183 = vrot.lane.b32.xlu1 %v178_v15, %s1550_s28 }
  0x1d   :  { %76 = vrot.lane.b32.xlu2 %v74_v16, %s1551_s29 }
  0x24   :  { %116 = vrot.lane.b32.xlu1 %v113_v17, %s1548_s22  ;;  %90 = vrot.lane.b32.xlu0 %v87_v18, %s1547_s17 }
  0x25   :  { %139 = vrot.lane.b32.xlu2 %v137_v19, %s1552_s5 }
  0x2c   :  { %179 = vrot.lane.b32.xlu1 %v176_v20, %s1550_s28  ;;  %153 = vrot.lane.b32.xlu0 %v150_v21, %s1549_s23 }
  0x2d   :  { %202 = vrot.lane.b32.xlu2 %v200_v22, %s1553_s10 }
  0x34   :  { %940 = vrot.lane.b32.xlu1 %v935_v24, %s1546_s16  ;;  %938 = vrot.lane.b32.xlu0 %v934_v25, %s1546_s16 }
  0x35   :  { %936 = vrot.lane.b32.xlu2 %v933_v26, %s1546_s16 }
  0x3c   :  { %826 = vrot.lane.b32.xlu1 %v821_v28, %s1547_s17  ;;  %824 = vrot.lane.b32.xlu0 %v820_v29, %s1547_s17 }
  0x3d   :  { %848 = vrot.lane.b32.xlu2 %v844_v31, %s1548_s22 }
  0x44   :  { %881 = vrot.lane.b32.xlu1 %v877_v33, %s1549_s23  ;;  %850 = vrot.lane.b32.xlu0 %v845_v34, %s1548_s22 }
  0x45   :  { %883 = vrot.lane.b32.xlu2 %v878_v35, %s1549_s23 }
  0x4c   :  { %907 = vrot.lane.b32.xlu1 %v902_v37, %s1550_s28  ;;  %905 = vrot.lane.b32.xlu0 %v901_v38, %s1550_s28 }
  0x4d   :  { %810 = vrot.lane.b32.xlu2 %v1497_v39, %s1551_s29 }
  0x54   :  { %846 = vrot.lane.b32.xlu1 %v843_v40, %s1548_s22  ;;  %822 = vrot.lane.b32.xlu0 %v819_v41, %s1547_s17 }
  0x55   :  { %867 = vrot.lane.b32.xlu2 %v1500_v42, %s1552_s5 }
  0x5c   :  { %903 = vrot.lane.b32.xlu1 %v900_v43, %s1550_s28  ;;  %879 = vrot.lane.b32.xlu0 %v876_v44, %s1549_s23  ;;  %v263_v44 = vsel %vm261_vm12, %v15_v36, 0 }
  0x5d   :  { %924 = vrot.lane.b32.xlu2 %v1503_v45, %s1553_s10 }
  0x5f   :  { %v1662_v46 = vpop.permute.xlu2 %94 }
  0x67   :  { %v1664_v48 = vpop.permute.xlu2 %118 }
  0x6f   :  { %v1669_v54 = vpop.permute.xlu2 %157 }
  0x76   :  { %v219_v59 = vpop.permute.xlu0 %218  ;;  %v217_v60 = vpop.permute.xlu1 %216 }
  0x77   :  { %v77_v62 = vpop.permute.xlu2 %76  ;;  %v223_v9 = vsel %vm222_vm5, %v217_v60, %v219_v59  ;;  %v16_v60 = vld [vmem:[%s2093_s1 + $0x8] sm:$0xff] }
  0x78   :  { %v78_v0 = vrot.slane %v77_v62, 1  ;;  %v227_v15 = vsel %vm1697_vm7, %v223_v9, 0.0 }
  0x7a   :  { %v80_v4 = vsel %vm79_vm1, %v77_v62, %v78_v0 }
  0x7b   :  { %83 = vst.msk [vmem:[#allocation2 + $0x1] ss:$8 sm:$0x3] %vm1683_vm4, %v80_v4  ;;  %v1554_v4 = vmov 0  }
  0x7c   :  { %1517 = vset.pattern.permute.xlu0 %v1554_v4  ;;  %1518 = vset.pattern.permute.xlu1 %v1554_v4 }
  0x7d   :  { %1519 = vset.pattern.permute.xlu2 %v1554_v4 }
  0x7e   :  { %v221_v6 = vpop.permute.xlu0 %220  ;;  %v93_v7 = vpop.permute.xlu1 %92 }
  0x7f   :  { %v224_v10 = vsel %vm222_vm5, %v219_v59, %v221_v6  ;;  %v140_v11 = vpop.permute.xlu2 %139  ;;  %v98_v30 = vsel %vm96_vm10, %v93_v7, %v1662_v46 }
  0x80   :  { %v228_v12 = vsel %vm1693_vm6, %v224_v10, 0.0  ;;  %v141_v13 = vrot.slane %v140_v11, 1  ;;  %v102_v33 = vsel %vm1693_vm6, %v98_v30, 0.0  ;;  %v266_v10 = vsel %vm261_vm12, %v16_v60, 0 }
  0x81   :  { %v231_v14 = vrot.slane %v228_v12, 7  ;;  %v105_v38 = vrot.slane %v102_v33, 7 }
  0x82   :  { %v143_v16 = vsel %vm142_vm8, %v140_v11, %v141_v13 }
  0x83   :  { %v232_v17 = vsel %vm65_vm3, %v227_v15, %v231_v14  ;;  %146 = vst.msk [vmem:[#allocation2 + $0x4] ss:$8 sm:$0x3] %vm1683_vm4, %v143_v16 }
  0x84   :  { %235 = vst.msk [vmem:[#allocation2 + $0x10] ss:$8 sm:$0x3] %vm1683_vm4, %v232_v17 }
  0x86   :  { %v121_v18 = vpop.permute.xlu0 %120  ;;  %v1713_v19 = vpop.permute.xlu1 %155 }
  0x87   :  { %v203_v20 = vpop.permute.xlu2 %202  ;;  %v124_v31 = vsel %vm122_vm11, %v1664_v48, %v121_v18  ;;  %v161_v47 = vsel %vm159_vm13, %v1713_v19, %v1669_v54  ;;  %v1765_v54 = vand.u32 4294901760, %v263_v44 }
  0x88   :  { %v204_v21 = vrot.slane %v203_v20, 1  ;;  %v128_v35 = vsel %vm1671_vm0, %v124_v31, 0.0  ;;  %v165_v57 = vsel %vm1693_vm6, %v161_v47, 0.0 }
  0x89   :  { %v131_v41 = vrot.slane %v128_v35, 7  ;;  %v168_v62 = vrot.slane %v165_v57, 7  ;;  %v1780_v3 = vsub.f32 %v263_v44, %v1765_v54 }
  0x8a   :  { %v206_v22 = vsel %vm205_vm9, %v203_v20, %v204_v21  ;;  %v1807_v21 = vand.u32 4294901760, %v266_v10 }
  0x8b   :  { %v239_v23 = vld [vmem:[#allocation2 + $0x10] sm:$0x1]  ;;  %209 = vst.msk [vmem:[#allocation2 + $0x7] ss:$8 sm:$0x3] %vm1683_vm4, %v206_v22  ;;  %v1805_v20 = vand.u32 4294901760, %v1780_v3 }
  0x8c   :  { %v275_v24 = vsel %vm65_vm3, %v239_v23, 0  ;;  %v240_v45 = vld [vmem:[#allocation2 + $0x18] sm:$0x1]  ;;  %v17_v23 = vld [vmem:[%s2093_s1 + $0x10] sm:$0xff]  ;;  %v1820_v33 = vsub.f32 %v266_v10, %v1807_v21 }
  0x8d   :  { %v1719_v25 = vand.u32 4294901760, %v275_v24  ;;  %v278_v56 = vsel %vm65_vm3, %v240_v45, 0  ;;  %v301_v31 = vsub.f32 %v1780_v3, %v1805_v20  ;;  %v269_v36 = vsel %vm261_vm12, %v17_v23, 0 }
  0x8e   :  { %v182_v26 = vpop.permute.xlu0 %181  ;;  %v184_v27 = vpop.permute.xlu1 %183  ;;  %v1777_v61 = vand.u32 4294901760, %v278_v56 }
  0x8f   :  { %295 = vmatpush.msra.mxu0 %v1719_v25  ;;  %430 = vmatpush.msra.mxu3 %v1719_v25  ;;  %v1724_v28 = vsub.f32 %v275_v24, %v1719_v25  ;;  %v1726_v29 = vpop.permute.xlu2 %936  ;;  %v187_v51 = vsel %vm185_vm14, %v182_v26, %v184_v27  ;;  %v1837_v45 = vand.u32 4294901760, %v301_v31 }
  0x90   :  { %v191_v59 = vsel %vm1671_vm0, %v187_v51, 0.0  ;;  %v1797_v18 = vsub.f32 %v278_v56, %v1777_v61  ;;  %v18_v56 = vld [vmem:[%s2093_s1 + $0x18] sm:$0xff] }
  0x91   :  { %390 = vmatpush.msra.mxu2 %v1724_v28  ;;  %v347_v32 = vand.u32 4294901760, %v1724_v28  ;;  %v194_v6 = vrot.slane %v191_v59, 7 }
  0x93   :  { %v348_v34 = vsub.f32 %v1724_v28, %v347_v32 }
  0x95   :  { %v349_v37 = vand.u32 4294901760, %v348_v34 }
  0x96   :  { %v117_v39 = vpop.permute.xlu1 %116  ;;  %v91_v40 = vpop.permute.xlu0 %90 }
  0x97   :  { %v123_v42 = vsel %vm122_vm11, %v117_v39, %v1664_v48  ;;  %v97_v43 = vsel %vm96_vm10, %v91_v40, %v93_v7  ;;  %350 = vmatpush.msra.mxu1 %v349_v37  ;;  %v1748_v46 = vpop.permute.xlu2 %848  ;;  %v1496_v48 = vld [vmem:[%s2092_s0 + $0x3] sm:$0x3] }
  0x98   :  { %v127_v49 = vsel %vm1677_vm2, %v123_v42, 0.0  ;;  %v101_v50 = vsel %vm1697_vm7, %v97_v43, 0.0  ;;  %v796_v58 = vperm.slane %v1496_v48, 1  ;;  %v795_v15 = vperm.slane %v1496_v48, 0 }
  0x99   :  { %v132_v52 = vsel %vm65_vm3, %v127_v49, %v131_v41  ;;  %v106_v53 = vsel %vm65_vm3, %v101_v50, %v105_v38  ;;  %v1840_v49 = vand.u32 4294901760, %v1820_v33  ;;  %v1842_v50 = vand.u32 4294901760, %v269_v36 }
  0x9a   :  { %135 = vst.msk [vmem:[#allocation2 + $0x3] ss:$8 sm:$0x3] %vm1683_vm4, %v132_v52  ;;  %v800_v12 = vsel %vm1671_vm0, %v796_v58, 0.0  ;;  %v799_v24 = vsel %vm1677_vm2, %v795_v15, 0.0 }
  0x9b   :  { %109 = vst.msk [vmem:[#allocation2 + $0x2] ss:$8 sm:$0x3] %vm1683_vm4, %v106_v53  ;;  %v803_v22 = vrot.slane %v800_v12, 7 }
  0x9d   :  { %v804_v38 = vsel %vm65_vm3, %v799_v24, %v803_v22 }
  0x9e   :  { %v180_v0 = vpop.permute.xlu1 %179  ;;  %v154_v1 = vpop.permute.xlu0 %153 }
  0x9f   :  { %v186_v7 = vsel %vm185_vm14, %v180_v0, %v182_v26  ;;  %v160_v9 = vsel %vm159_vm13, %v154_v1, %v1713_v19  ;;  %v1786_v11 = vpop.permute.xlu2 %883  ;;  %v19_v19 = vld [vmem:[%s2094_s2] sm:$0xff]  ;;  %v599_v26 = vand.u32 4294901760, %v1797_v18  ;;  %v309_v0 = vsub.f32 %v1820_v33, %v1840_v49 }
  0xa0   :  { %v190_v13 = vsel %vm1677_vm2, %v186_v7, 0.0  ;;  %v164_v14 = vsel %vm1697_vm7, %v160_v9, 0.0  ;;  %243 = vperm.xlu0 %1517, %v19_v19   ;;  %v1865_v1 = vsub.f32 %v269_v36, %v1842_v50  ;;  %v272_v7 = vsel %vm261_vm12, %v18_v56, 0 }
  0xa1   :  { %v195_v16 = vsel %vm65_vm3, %v190_v13, %v194_v6  ;;  %v169_v17 = vsel %vm65_vm3, %v164_v14, %v168_v62  ;;  %v600_v43 = vsub.f32 %v1797_v18, %v599_v26  ;;  %v1873_v14 = vand.u32 4294901760, %v309_v0 }
  0xa2   :  { %198 = vst.msk [vmem:[#allocation2 + $0x6] ss:$8 sm:$0x3] %vm1683_vm4, %v195_v16  ;;  %v1876_v28 = vand.u32 4294901760, %v1865_v1 }
  0xa3   :  { %172 = vst.msk [vmem:[#allocation2 + $0x5] ss:$8 sm:$0x3] %vm1683_vm4, %v169_v17  ;;  %v601_v57 = vand.u32 4294901760, %v600_v43 }
  0xa4   :  { %v317_v23 = vsub.f32 %v1865_v1, %v1876_v28 }
  0xa6   :  { %v941_v27 = vpop.permute.xlu1 %940  ;;  %v939_v30 = vpop.permute.xlu0 %938 }
  0xa7   :  { %v943_v34 = vsel %vm222_vm5, %v939_v30, %v941_v27  ;;  %v942_v35 = vsel %vm222_vm5, %v1726_v29, %v939_v30  ;;  %v811_v37 = vpop.permute.xlu2 %810  ;;  %v20_v29 = vld [vmem:[%s2094_s2 + $0x8] sm:$0xff]  ;;  %v1902_v30 = vand.u32 4294901760, %v317_v23 }
  0xa8   :  { %v947_v39 = vsel %vm1693_vm6, %v943_v34, 0.0  ;;  %v946_v40 = vsel %vm1697_vm7, %v942_v35, 0.0  ;;  %v812_v41 = vrot.slane %v811_v37, 1  ;;  %248 = vperm.xlu1 %1518, %v20_v29  }
  0xa9   :  { %v950_v42 = vrot.slane %v947_v39, 7 }
  0xaa   :  { %v237_v44 = vld [vmem:[#allocation2] sm:$0xff]  ;;  %v238_v47 = vld [vmem:[#allocation2 + $0x8] sm:$0xff]  ;;  %v813_v48 = vsel %vm79_vm1, %v811_v37, %v812_v41 }
  0xab   :  { %v951_v51 = vsel %vm65_vm3, %v946_v40, %v950_v42  ;;  %v296_v52 = vand.u32 4294901760, %v237_v44  ;;  %v1846_v53 = vand.u32 4294901760, %v238_v47  ;;  %806 = vst.msk [vmem:[#allocation2] ss:$8 sm:$0x3] %vm1683_vm4, %v804_v38 }
  0xac   :  { %953 = vst.msk [vmem:[#allocation2 + $0x10] ss:$8 sm:$0x3] %vm1683_vm4, %v951_v51 }
  0xad   :  { %297 = vmatpush.msra.mxu0 %v296_v52  ;;  %432 = vmatpush.msra.mxu3 %v296_v52  ;;  %v352_v58 = vsub.f32 %v237_v44, %v296_v52  ;;  %v604_v59 = vsub.f32 %v238_v47, %v1846_v53  ;;  %815 = vst.msk [vmem:[#allocation2 + $0x1] ss:$8 sm:$0x3] %vm1683_vm4, %v813_v48 }
  0xae   :  { %303 = vmatmul.f32.vlgmr.msra.gmra.mxu0 %v1837_v45  ;;  %436 = vmatmul.f32.vlgmr.msra.gmra.mxu3 %v1805_v20  ;;  %v827_v60 = vpop.permute.xlu1 %826  ;;  %v1860_v62 = vpop.permute.xlu0 %824 }
  0xaf   :  { %475 = vmatpush.msrb.mxu0 %v347_v32  ;;  %602 = vmatpush.msrb.mxu3 %v601_v57  ;;  %v353_v4 = vand.u32 4294901760, %v352_v58  ;;  %v605_v6 = vand.u32 4294901760, %v604_v59  ;;  %v868_v9 = vpop.permute.xlu2 %867  ;;  %v1878_v32 = vand.u32 4294901760, %v272_v7  ;;  %v829_v38 = vsel %vm96_vm10, %v1860_v62, %v827_v60 }
  0xb0   :  { %393 = vmatpush.msra.mxu2 %v352_v58  ;;  %v869_v10 = vrot.slane %v868_v9, 1  ;;  %v833_v40 = vsel %vm1693_vm6, %v829_v38, 0.0 }
  0xb1   :  { %396 = vmatmul.f32.vlgmr.msra.gmra.mxu2 %v1780_v3  ;;  %479 = vmatpush.msrb.mxu0 %v353_v4  ;;  %v354_v12 = vsub.f32 %v352_v58, %v353_v4  ;;  %v606_v13 = vsub.f32 %v604_v59, %v605_v6  ;;  %v1892_v24 = vsub.f32 %v272_v7, %v1878_v32  ;;  %v836_v29 = vrot.slane %v833_v40, 7 }
  0xb2   :  { %547 = vmatpush.msrb.mxu2 %v1777_v61  ;;  %v870_v15 = vsel %vm142_vm8, %v868_v9, %v869_v10 }
  0xb3   :  { %642 = vmatpush.msra.mxu0 %v1797_v18  ;;  %v355_v16 = vand.u32 4294901760, %v354_v12  ;;  %v607_v17 = vand.u32 4294901760, %v606_v13  ;;  %872 = vst.msk [vmem:[#allocation2 + $0x4] ss:$8 sm:$0x3] %vm1683_vm4, %v870_v15  ;;  %v1905_v31 = vand.u32 4294901760, %v1892_v24 }
  0xb4   :  { %549 = vmatpush.msrb.mxu2 %v1846_v53  ;;  %v957_v37 = vld [vmem:[#allocation2 + $0x10] sm:$0x1]  ;;  %v958_v8 = vld [vmem:[#allocation2 + $0x18] sm:$0x1] }
  0xb5   :  { %645 = vmatpush.msra.mxu0 %v604_v59  ;;  %356 = vmatpush.msra.mxu1 %v355_v16  ;;  %v325_v36 = vsub.f32 %v1892_v24, %v1905_v31  ;;  %v21_v59 = vld [vmem:[%s2094_s2 + $0x10] sm:$0xff]  ;;  %v963_v23 = vsel %vm65_vm3, %v958_v8, 0 }
  0xb6   :  { %727 = vmatpush.msra.mxu2 %v599_v26  ;;  %608 = vmatpush.msrb.mxu3 %v607_v17  ;;  %v1887_v19 = vpop.permute.xlu1 %881  ;;  %v851_v22 = vpop.permute.xlu0 %850  ;;  %v22_v26 = vld [vmem:[%s2094_s2 + $0x18] sm:$0xff]  ;;  %s1555_s2 = smov [#allocation3]  }
  0xb7   :  { %311 = vmatmul.f32.gmra.mxu0 %v1873_v14  ;;  %358 = vmatmul.f32.vlgmr.msra.gmra.mxu1 %v1765_v54  ;;  %v925_v27 = vpop.permute.xlu2 %924  ;;  %v853_v39 = vsel %vm122_vm11, %v1748_v46, %v851_v22  ;;  %v1928_v42 = vand.u32 4294901760, %v325_v36  ;;  %v886_v51 = vsel %vm159_vm13, %v1887_v19, %v1786_v11  ;;  %s1482_s18 = sshll.u32 %s1555_s2, 4  ;;  %s1483_s18 = int_to_ptr.vmem [resolvable:$true] %s1482_s18 }
  0xb8   :  { %731 = vmatpush.msra.mxu2 %v605_v6  ;;  %442 = vmatmul.f32.gmra.mxu3 %v1840_v49  ;;  %v926_v18 = vrot.slane %v925_v27, 1  ;;  %v857_v41 = vsel %vm1671_vm0, %v853_v39, 0.0 }
  0xb9   :  { %512 = vmatpush.msrb.mxu1 %v1719_v25  ;;  %764 = vmatpush.msra.mxu3 %v1777_v61  ;;  %v860_v44 = vrot.slane %v857_v41, 7 }
  0xba   :  { %401 = vmatmul.f32.gmra.mxu2 %v1820_v33  ;;  %v927_v34 = vsel %vm205_vm9, %v925_v27, %v926_v18  ;;  %258 = vperm.xlu1 %1518, %v22_v26   ;;  %v1231_v26 = vand.u32 4294901760, %v963_v23 }
  0xbb   :  { %514 = vmatpush.msrb.mxu1 %v296_v52  ;;  %766 = vmatpush.msra.mxu3 %v1846_v53  ;;  %929 = vst.msk [vmem:[#allocation2 + $0x7] ss:$8 sm:$0x3] %vm1683_vm4, %v927_v34 }
  0xbc   :  { %253 = vperm.xlu2 %1519, %v21_v59   ;;  %v1283_v36 = vsub.f32 %v963_v23, %v1231_v26 }
  0xbd   :  { %682 = vmatpush.msra.mxu1 %v1777_v61  ;;  %v960_v61 = vsel %vm65_vm3, %v957_v37, 0 }
  0xbe   :  { %v908_v25 = vpop.permute.xlu1 %907  ;;  %v906_v35 = vpop.permute.xlu0 %905  ;;  %v1930_v43 = vand.u32 4294901760, %v960_v61  ;;  %v1284_v38 = vand.u32 4294901760, %v1283_v36 }
  0xbf   :  { %684 = vmatpush.msra.mxu1 %v1846_v53  ;;  %319 = vmatmul.f32.gmra.mxu0 %v1902_v30  ;;  %v910_v52 = vsel %vm185_vm14, %v906_v35, %v908_v25 }
  0xc0   :  { %362 = vmatmul.f32.gmra.mxu1 %v1807_v21  ;;  %448 = vmatmul.f32.gmra.mxu3 %v1876_v28  ;;  %v1948_v11 = vsub.f32 %v960_v61, %v1930_v43  ;;  %v914_v0 = vsel %vm1671_vm0, %v910_v52, 0.0  ;;  %v1285_v61 = vsub.f32 %v1283_v36, %v1284_v38 }
  0xc1   :  { %v917_v7 = vrot.slane %v914_v0, 7 }
  0xc2   :  { %406 = vmatmul.f32.gmra.mxu2 %v1865_v1  ;;  %v1032_v4 = vand.u32 4294901760, %v1948_v11  ;;  %v1286_v41 = vand.u32 4294901760, %v1285_v61 }
  0xc4   :  { %v1033_v15 = vsub.f32 %v1948_v11, %v1032_v4 }
  0xc6   :  { %v847_v47 = vpop.permute.xlu1 %846  ;;  %v823_v48 = vpop.permute.xlu0 %822  ;;  %v1034_v63 = vand.u32 4294901760, %v1033_v15 }
  0xc7   :  { %327 = vmatmul.f32.gmra.mxu0 %v1928_v42  ;;  %v852_v53 = vsel %vm122_vm11, %v847_v47, %v1748_v46  ;;  %v828_v56 = vsel %vm96_vm10, %v823_v48, %v1860_v62  ;;  %v890_v62 = vsel %vm1693_vm6, %v886_v51, 0.0 }
  0xc8   :  { %366 = vmatmul.f32.gmra.mxu1 %v1842_v50  ;;  %454 = vmatmul.f32.gmra.mxu3 %v1905_v31  ;;  %v856_v57 = vsel %vm1677_vm2, %v852_v53, 0.0  ;;  %v832_v58 = vsel %vm1697_vm7, %v828_v56, 0.0  ;;  %v893_v6 = vrot.slane %v890_v62, 7 }
  0xc9   :  { %v861_v46 = vsel %vm65_vm3, %v856_v57, %v860_v44  ;;  %v837_v60 = vsel %vm65_vm3, %v832_v58, %v836_v29 }
  0xca   :  { %411 = vmatmul.f32.gmra.mxu2 %v1892_v24  ;;  %863 = vst.msk [vmem:[#allocation2 + $0x3] ss:$8 sm:$0x3] %vm1683_vm4, %v861_v46 }
  0xcb   :  { %839 = vst.msk [vmem:[#allocation2 + $0x2] ss:$8 sm:$0x3] %vm1683_vm4, %v837_v60 }
  0xce   :  { %v904_v9 = vpop.permute.xlu1 %903  ;;  %v880_v10 = vpop.permute.xlu0 %879 }
  0xcf   :  { %481 = vmatmul.f32.vlgmr.msrb.gmra.mxu0 %v1765_v54  ;;  %v909_v5 = vsel %vm185_vm14, %v904_v9, %v906_v35  ;;  %v885_v55 = vsel %vm159_vm13, %v880_v10, %v1887_v19 }
  0xd0   :  { %370 = vmatmul.f32.gmra.mxu1 %v1878_v32  ;;  %980 = vmatpush.msrb.mxu0 %v1930_v43  ;;  %v913_v12 = vsel %vm1677_vm2, %v909_v5, 0.0  ;;  %v889_v13 = vsel %vm1697_vm7, %v885_v55, 0.0 }
  0xd1   :  { %610 = vmatmul.f32.vlgmr.msrb.gmra.mxu3 %v1765_v54  ;;  %v918_v16 = vsel %vm65_vm3, %v913_v12, %v917_v7  ;;  %v894_v17 = vsel %vm65_vm3, %v889_v13, %v893_v6 }
  0xd2   :  { %555 = vmatmul.f32.vlgmr.msrb.gmra.mxu2 %v1837_v45  ;;  %1115 = vmatpush.msrb.mxu3 %v1930_v43  ;;  %920 = vst.msk [vmem:[#allocation2 + $0x6] ss:$8 sm:$0x3] %vm1683_vm4, %v918_v16 }
  0xd3   :  { %1075 = vmatpush.msrb.mxu2 %v1948_v11  ;;  %896 = vst.msk [vmem:[#allocation2 + $0x5] ss:$8 sm:$0x3] %vm1683_vm4, %v894_v17 }
  0xd7   :  { %485 = vmatmul.f32.gmra.mxu0 %v1807_v21 }
  0xd8   :  { %516 = vmatmul.f32.vlgmr.msrb.gmra.mxu1 %v1765_v54 }
  0xd9   :  { %614 = vmatmul.f32.gmra.mxu3 %v1807_v21  ;;  %1035 = vmatpush.msrb.mxu1 %v1034_v63 }
  0xda   :  { %563 = vmatmul.f32.gmra.mxu2 %v1873_v14  ;;  %v955_v19 = vld [vmem:[#allocation2] sm:$0xff]  ;;  %v956_v27 = vld [vmem:[#allocation2 + $0x8] sm:$0xff] }
  0xdb   :  { %v981_v22 = vand.u32 4294901760, %v955_v19  ;;  %v1233_v34 = vand.u32 4294901760, %v956_v27 }
  0xdd   :  { %982 = vmatpush.msrb.mxu0 %v981_v22  ;;  %1117 = vmatpush.msrb.mxu3 %v981_v22  ;;  %v1037_v2 = vsub.f32 %v955_v19, %v981_v22  ;;  %v1289_v37 = vsub.f32 %v956_v27, %v1233_v34 }
  0xdf   :  { %489 = vmatmul.f32.gmra.mxu0 %v1842_v50  ;;  %1078 = vmatpush.msrb.mxu2 %v1037_v2  ;;  %v1038_v18 = vand.u32 4294901760, %v1037_v2  ;;  %v1290_v39 = vand.u32 4294901760, %v1289_v37 }
  0xe0   :  { %520 = vmatmul.f32.gmra.mxu1 %v1807_v21 }
  0xe1   :  { %618 = vmatmul.f32.gmra.mxu3 %v1842_v50  ;;  %v1039_v25 = vsub.f32 %v1037_v2, %v1038_v18  ;;  %v1291_v40 = vsub.f32 %v1289_v37, %v1290_v39 }
  0xe2   :  { %571 = vmatmul.f32.gmra.mxu2 %v1902_v30 }
  0xe3   :  { %v1040_v35 = vand.u32 4294901760, %v1039_v25  ;;  %v1292_v29 = vand.u32 4294901760, %v1291_v40 }
  0xe5   :  { %1041 = vmatpush.msrb.mxu1 %v1040_v35 }
  0xe7   :  { %493 = vmatmul.f32.gmra.mxu0 %v1878_v32 }
  0xe8   :  { %524 = vmatmul.f32.gmra.mxu1 %v1842_v50 }
  0xe9   :  { %622 = vmatmul.f32.gmra.mxu3 %v1878_v32 }
  0xea   :  { %579 = vmatmul.f32.gmra.mxu2 %v1928_v42 }
  0xef   :  { %648 = vmatmul.f32.vlgmr.msra.gmra.mxu0 %v1780_v3 }
  0xf0   :  { %528 = vmatmul.f32.gmra.mxu1 %v1878_v32  ;;  %1160 = vmatpush.msra.mxu0 %v1032_v4 }
  0xf1   :  { %768 = vmatmul.f32.vlgmr.msra.gmra.mxu3 %v1765_v54 }
  0xf2   :  { %1287 = vmatpush.msra.mxu3 %v1286_v41  ;;  %733 = vmatmul.f32.vlgmr.msra.gmra.mxu2 %v1765_v54 }
  0xf3   :  { %1164 = vmatpush.msra.mxu0 %v1038_v18  ;;  %1232 = vmatpush.msra.mxu2 %v1231_v26 }
  0xf4   :  { %1293 = vmatpush.msra.mxu3 %v1292_v29 }
  0xf5   :  { %1234 = vmatpush.msra.mxu2 %v1233_v34 }
  0xf7   :  { %653 = vmatmul.f32.gmra.mxu0 %v1820_v33 }
  0xf8   :  { %688 = vmatmul.f32.vlgmr.msra.gmra.mxu1 %v1805_v20 }
  0xf9   :  { %772 = vmatmul.f32.gmra.mxu3 %v1807_v21  ;;  %1197 = vmatpush.msra.mxu1 %v1930_v43 }
  0xfa   :  { %737 = vmatmul.f32.gmra.mxu2 %v1807_v21 }
  0xfb   :  { %1199 = vmatpush.msra.mxu1 %v981_v22 }
  0xff   :  { %658 = vmatmul.f32.gmra.mxu0 %v1865_v1 }
 0x100   :  { %694 = vmatmul.f32.gmra.mxu1 %v1840_v49 }
 0x101   :  { %776 = vmatmul.f32.gmra.mxu3 %v1842_v50 }
 0x102   :  { %741 = vmatmul.f32.gmra.mxu2 %v1842_v50 }
 0x107   :  { %663 = vmatmul.f32.gmra.mxu0 %v1892_v24 }
 0x108   :  { %700 = vmatmul.f32.gmra.mxu1 %v1876_v28 }
 0x109   :  { %780 = vmatmul.f32.gmra.mxu3 %v1878_v32 }
 0x10a   :  { %745 = vmatmul.f32.gmra.mxu2 %v1878_v32 }
 0x10f   :  { %988 = vmatmul.f32.vlgmr.msrb.gmra.mxu0 %v1837_v45 }
 0x110   :  { %706 = vmatmul.f32.gmra.mxu1 %v1905_v31  ;;  %1327 = vmatpush.msrb.mxu0 %v1283_v36 }
 0x111   :  { %1121 = vmatmul.f32.vlgmr.msrb.gmra.mxu3 %v1805_v20 }
 0x112   :  { %1449 = vmatpush.msrb.mxu3 %v1231_v26  ;;  %1081 = vmatmul.f32.vlgmr.msrb.gmra.mxu2 %v1780_v3 }
 0x113   :  { %1330 = vmatpush.msrb.mxu0 %v1289_v37  ;;  %1412 = vmatpush.msrb.mxu2 %v1284_v38 }
 0x114   :  { %1451 = vmatpush.msrb.mxu3 %v1233_v34 }
 0x115   :  { %1416 = vmatpush.msrb.mxu2 %v1290_v39 }
 0x117   :  { %996 = vmatmul.f32.gmra.mxu0 %v1873_v14 }
 0x118   :  { %1043 = vmatmul.f32.vlgmr.msrb.gmra.mxu1 %v1765_v54 }
 0x119   :  { %1367 = vmatpush.msrb.mxu1 %v1231_v26  ;;  %1127 = vmatmul.f32.gmra.mxu3 %v1840_v49 }
 0x11a   :  { %1086 = vmatmul.f32.gmra.mxu2 %v1820_v33  ;;  %v2051_v62 = vpop.permute.xlu1 %248 }
 0x11b   :  { %1369 = vmatpush.msrb.mxu1 %v1233_v34 }
 0x11f   :  { %1004 = vmatmul.f32.gmra.mxu0 %v1902_v30 }
 0x120   :  { %1047 = vmatmul.f32.gmra.mxu1 %v1807_v21 }
 0x121   :  { %1133 = vmatmul.f32.gmra.mxu3 %v1876_v28 }
 0x122   :  { %1091 = vmatmul.f32.gmra.mxu2 %v1865_v1 }
 0x127   :  { %1012 = vmatmul.f32.gmra.mxu0 %v1928_v42 }
 0x128   :  { %1051 = vmatmul.f32.gmra.mxu1 %v1842_v50 }
 0x129   :  { %1139 = vmatmul.f32.gmra.mxu3 %v1905_v31 }
 0x12a   :  { %1096 = vmatmul.f32.gmra.mxu2 %v1892_v24 }
 0x12b   :  { %v304_v43 = vpop.f32.mrf.mxu0 }
 0x12c   :  { %v2065_v19 = vpop.permute.xlu1 %258 }
 0x12f   :  { %1166 = vmatmul.f32.vlgmr.msra.gmra.mxu0 %v1765_v54 }
 0x130   :  { %1055 = vmatmul.f32.gmra.mxu1 %v1878_v32 }
 0x131   :  { %1295 = vmatmul.f32.vlgmr.msra.gmra.mxu3 %v1765_v54  ;;  %v437_v44 = vpop.f32.mrf.mxu3 }
 0x132   :  { %1240 = vmatmul.f32.vlgmr.msra.gmra.mxu2 %v1837_v45  ;;  %v2044_v45 = vpop.permute.xlu0 %243 }
 0x134   :  { %v312_v47 = vpop.f32.mrf.mxu0  ;;  %v359_v48 = vpop.f32.mrf.mxu1 }
 0x135   :  { %v397_v51 = vpop.f32.mrf.mxu2  ;;  %v313_v9 = vadd.f32 %v312_v47, %v2051_v62 }
 0x137   :  { %1170 = vmatmul.f32.gmra.mxu0 %v1807_v21 }
 0x138   :  { %1201 = vmatmul.f32.vlgmr.msra.gmra.mxu1 %v1765_v54 }
 0x139   :  { %1299 = vmatmul.f32.gmra.mxu3 %v1807_v21 }
 0x13a   :  { %1248 = vmatmul.f32.gmra.mxu2 %v1873_v14  ;;  %v305_v14 = vadd.f32 %v304_v43, %v2044_v45 }
 0x13b   :  { %v443_v53 = vpop.f32.mrf.mxu3 }
 0x13c   :  { %v320_v52 = vpop.f32.mrf.mxu0  ;;  %v360_v60 = vadd.f32 %v359_v48, %v305_v14 }
 0x13d   :  { %v363_v56 = vpop.f32.mrf.mxu1  ;;  %v402_v57 = vpop.f32.mrf.mxu2 }
 0x13e   :  { %v398_v7 = vadd.f32 %v397_v51, %v360_v60  ;;  %v364_v5 = vadd.f32 %v363_v56, %v313_v9 }
 0x13f   :  { %1174 = vmatmul.f32.gmra.mxu0 %v1842_v50 }
 0x140   :  { %1205 = vmatmul.f32.gmra.mxu1 %v1807_v21  ;;  %v438_v10 = vadd.f32 %v437_v44, %v398_v7  ;;  %v403_v17 = vadd.f32 %v402_v57, %v364_v5 }
 0x141   :  { %1303 = vmatmul.f32.gmra.mxu3 %v1842_v50 }
 0x142   :  { %1256 = vmatmul.f32.gmra.mxu2 %v1902_v30 }
 0x143   :  { %v449_v11 = vpop.f32.mrf.mxu3 }
 0x144   :  { %v328_v58 = vpop.f32.mrf.mxu0 }
 0x145   :  { %v367_v59 = vpop.f32.mrf.mxu1  ;;  %v407_v46 = vpop.f32.mrf.mxu2  ;;  %v329_v34 = vadd.f32 %v328_v58, %v2065_v19 }
 0x147   :  { %1178 = vmatmul.f32.gmra.mxu0 %v1878_v32 }
 0x148   :  { %1209 = vmatmul.f32.gmra.mxu1 %v1842_v50 }
 0x149   :  { %1307 = vmatmul.f32.gmra.mxu3 %v1878_v32 }
 0x14a   :  { %1264 = vmatmul.f32.gmra.mxu2 %v1928_v42  ;;  %v2058_v42 = vpop.permute.xlu2 %253 }
 0x14b   :  { %v455_v0 = vpop.f32.mrf.mxu3  ;;  %v321_v63 = vadd.f32 %v320_v52, %v2058_v42 }
 0x14c   :  { %v482_v30 = vpop.f32.mrf.mxu0 }
 0x14d   :  { %v371_v4 = vpop.f32.mrf.mxu1  ;;  %v412_v6 = vpop.f32.mrf.mxu2  ;;  %v483_v55 = vadd.f32 %v482_v30, %v438_v10 }
 0x14f   :  { %1333 = vmatmul.f32.vlgmr.msrb.gmra.mxu0 %v1780_v3  ;;  %v444_v3 = vadd.f32 %v443_v53, %v403_v17 }
 0x150   :  { %1213 = vmatmul.f32.gmra.mxu1 %v1878_v32 }
 0x151   :  { %1453 = vmatmul.f32.vlgmr.msrb.gmra.mxu3 %v1765_v54 }
 0x152   :  { %1418 = vmatmul.f32.vlgmr.msrb.gmra.mxu2 %v1765_v54  ;;  %v368_v54 = vadd.f32 %v367_v59, %v321_v63 }
 0x154   :  { %v486_v12 = vpop.f32.mrf.mxu0  ;;  %v611_v13 = vpop.f32.mrf.mxu3  ;;  %v408_v26 = vadd.f32 %v407_v46, %v368_v54 }
 0x155   :  { %v517_v15 = vpop.f32.mrf.mxu1  ;;  %v556_v16 = vpop.f32.mrf.mxu2  ;;  %v487_v22 = vadd.f32 %v486_v12, %v444_v3 }
 0x156   :  { %v518_v8 = vadd.f32 %v517_v15, %v483_v55  ;;  %v557_v43 = vadd.f32 %v556_v16, %v2044_v45 }
 0x157   :  { %1338 = vmatmul.f32.gmra.mxu0 %v1820_v33 }
 0x158   :  { %784 = vst [vmem:[#allocation3] sm:$0xff] %v518_v8  ;;  %1373 = vmatmul.f32.vlgmr.msrb.gmra.mxu1 %v1805_v20  ;;  %v450_v20 = vadd.f32 %v449_v11, %v408_v26 }
 0x159   :  { %1457 = vmatmul.f32.gmra.mxu3 %v1807_v21 }
 0x15a   :  { %1422 = vmatmul.f32.gmra.mxu2 %v1807_v21  ;;  %v372_v21 = vadd.f32 %v371_v4, %v329_v34 }
 0x15c   :  { %v490_v23 = vpop.f32.mrf.mxu0  ;;  %v615_v27 = vpop.f32.mrf.mxu3  ;;  %v413_v39 = vadd.f32 %v412_v6, %v372_v21 }
 0x15d   :  { %v521_v2 = vpop.f32.mrf.mxu1  ;;  %v564_v18 = vpop.f32.mrf.mxu2  ;;  %v491_v25 = vadd.f32 %v490_v23, %v450_v20 }
 0x15e   :  { %v522_v33 = vadd.f32 %v521_v2, %v487_v22  ;;  %v565_v53 = vadd.f32 %v564_v18, %v2051_v62 }
 0x15f   :  { %1343 = vmatmul.f32.gmra.mxu0 %v1865_v1 }
 0x160   :  { %786 = vst [vmem:[#allocation3 + $0x10] sm:$0xff] %v522_v33  ;;  %1379 = vmatmul.f32.gmra.mxu1 %v1840_v49  ;;  %v456_v49 = vadd.f32 %v455_v0, %v413_v39  ;;  %v616_v57 = vadd.f32 %v615_v27, %v565_v53 }
 0x161   :  { %1461 = vmatmul.f32.gmra.mxu3 %v1842_v50 }
 0x162   :  { %1426 = vmatmul.f32.gmra.mxu2 %v1842_v50 }
 0x164   :  { %v494_v35 = vpop.f32.mrf.mxu0  ;;  %v619_v36 = vpop.f32.mrf.mxu3 }
 0x165   :  { %v525_v37 = vpop.f32.mrf.mxu1  ;;  %v572_v38 = vpop.f32.mrf.mxu2  ;;  %v495_v1 = vadd.f32 %v494_v35, %v456_v49 }
 0x166   :  { %v526_v61 = vadd.f32 %v525_v37, %v491_v25 }
 0x167   :  { %1348 = vmatmul.f32.gmra.mxu0 %v1892_v24  ;;  %v612_v24 = vadd.f32 %v611_v13, %v557_v43 }
 0x168   :  { %788 = vst [vmem:[#allocation3 + $0x20] sm:$0xff] %v526_v61  ;;  %1385 = vmatmul.f32.gmra.mxu1 %v1876_v28 }
 0x169   :  { %1465 = vmatmul.f32.gmra.mxu3 %v1878_v32 }
 0x16a   :  { %1430 = vmatmul.f32.gmra.mxu2 %v1878_v32 }
 0x16c   :  { %v649_v40 = vpop.f32.mrf.mxu0  ;;  %v623_v50 = vpop.f32.mrf.mxu3 }
 0x16d   :  { %v529_v41 = vpop.f32.mrf.mxu1  ;;  %v580_v29 = vpop.f32.mrf.mxu2  ;;  %v650_v47 = vadd.f32 %v649_v40, %v612_v24 }
 0x16e   :  { %v530_v44 = vadd.f32 %v529_v41, %v495_v1  ;;  %v581_v12 = vadd.f32 %v580_v29, %v2065_v19 }
 0x170   :  { %790 = vst [vmem:[#allocation3 + $0x30] sm:$0xff] %v530_v44  ;;  %1391 = vmatmul.f32.gmra.mxu1 %v1905_v31  ;;  %v573_v31 = vadd.f32 %v572_v38, %v2058_v42  ;;  %v624_v16 = vadd.f32 %v623_v50, %v581_v12 }
 0x172   :  { %v620_v4 = vadd.f32 %v619_v36, %v573_v31 }
 0x174   :  { %v654_v48 = vpop.f32.mrf.mxu0  ;;  %v769_v28 = vpop.f32.mrf.mxu3 }
 0x175   :  { %v689_v51 = vpop.f32.mrf.mxu1  ;;  %v734_v52 = vpop.f32.mrf.mxu2  ;;  %v655_v11 = vadd.f32 %v654_v48, %v616_v57 }
 0x176   :  { %v690_v32 = vadd.f32 %v689_v51, %v650_v47 }
 0x178   :  { %v735_v56 = vadd.f32 %v734_v52, %v690_v32 }
 0x17a   :  { %v770_v58 = vadd.f32 %v769_v28, %v735_v56 }
 0x17c   :  { %785 = vst [vmem:[#allocation3 + $0x8] sm:$0xff] %v770_v58  ;;  %v659_v59 = vpop.f32.mrf.mxu0  ;;  %v773_v46 = vpop.f32.mrf.mxu3 }
 0x17d   :  { %v695_v14 = vpop.f32.mrf.mxu1  ;;  %v738_v60 = vpop.f32.mrf.mxu2  ;;  %v660_v7 = vadd.f32 %v659_v59, %v620_v4 }
 0x17e   :  { %v696_v30 = vadd.f32 %v695_v14, %v655_v11 }
 0x180   :  { %v739_v0 = vadd.f32 %v738_v60, %v696_v30 }
 0x182   :  { %v774_v6 = vadd.f32 %v773_v46, %v739_v0 }
 0x184   :  { %787 = vst [vmem:[#allocation3 + $0x18] sm:$0xff] %v774_v6  ;;  %v664_v9 = vpop.f32.mrf.mxu0  ;;  %v777_v10 = vpop.f32.mrf.mxu3 }
 0x185   :  { %v701_v5 = vpop.f32.mrf.mxu1  ;;  %v742_v55 = vpop.f32.mrf.mxu2  ;;  %v665_v63 = vadd.f32 %v664_v9, %v624_v16 }
 0x186   :  { %v702_v13 = vadd.f32 %v701_v5, %v660_v7 }
 0x188   :  { %v743_v15 = vadd.f32 %v742_v55, %v702_v13 }
 0x18a   :  { %v778_v17 = vadd.f32 %v777_v10, %v743_v15 }
 0x18c   :  { %789 = vst [vmem:[#allocation3 + $0x28] sm:$0xff] %v778_v17  ;;  %v989_v8 = vpop.f32.mrf.mxu0  ;;  %v781_v3 = vpop.f32.mrf.mxu3 }
 0x18d   :  { %v707_v54 = vpop.f32.mrf.mxu1  ;;  %v746_v22 = vpop.f32.mrf.mxu2  ;;  %v990_v61 = vadd.f32 %v989_v8, %v2044_v45 }
 0x18e   :  { %v708_v23 = vadd.f32 %v707_v54, %v665_v63 }
 0x190   :  { %v747_v27 = vadd.f32 %v746_v22, %v708_v23 }
 0x192   :  { %v782_v2 = vadd.f32 %v781_v3, %v747_v27 }
 0x194   :  { %791 = vst [vmem:[#allocation3 + $0x38] sm:$0xff] %v782_v2  ;;  %v997_v18 = vpop.f32.mrf.mxu0  ;;  %v1122_v26 = vpop.f32.mrf.mxu3 }
 0x195   :  { %v1044_v34 = vpop.f32.mrf.mxu1  ;;  %v1082_v33 = vpop.f32.mrf.mxu2  ;;  %v998_v29 = vadd.f32 %v997_v18, %v2051_v62 }
 0x196   :  { %v1045_v49 = vadd.f32 %v1044_v34, %v990_v61 }
 0x198   :  { %v1083_v43 = vadd.f32 %v1082_v33, %v1045_v49 }
 0x19a   :  { %v1123_v44 = vadd.f32 %v1122_v26, %v1083_v43 }
 0x19c   :  { %v1005_v20 = vpop.f32.mrf.mxu0  ;;  %v1128_v21 = vpop.f32.mrf.mxu3 }
 0x19d   :  { %v1048_v25 = vpop.f32.mrf.mxu1  ;;  %v1087_v35 = vpop.f32.mrf.mxu2  ;;  %v1006_v53 = vadd.f32 %v1005_v20, %v2058_v42 }
 0x19e   :  { %v1049_v24 = vadd.f32 %v1048_v25, %v998_v29 }
 0x1a0   :  { %v1088_v32 = vadd.f32 %v1087_v35, %v1049_v24 }
 0x1a2   :  { %v1129_v57 = vadd.f32 %v1128_v21, %v1088_v32 }
 0x1a4   :  { %v1013_v36 = vpop.f32.mrf.mxu0  ;;  %v1134_v37 = vpop.f32.mrf.mxu3 }
 0x1a5   :  { %v1052_v38 = vpop.f32.mrf.mxu1  ;;  %v1092_v39 = vpop.f32.mrf.mxu2  ;;  %v1014_v31 = vadd.f32 %v1013_v36, %v2065_v19 }
 0x1a6   :  { %v1053_v58 = vadd.f32 %v1052_v38, %v1006_v53 }
 0x1a8   :  { %v1093_v30 = vadd.f32 %v1092_v39, %v1053_v58 }
 0x1aa   :  { %v1135_v4 = vadd.f32 %v1134_v37, %v1093_v30 }
 0x1ac   :  { %v1167_v1 = vpop.f32.mrf.mxu0  ;;  %v1140_v40 = vpop.f32.mrf.mxu3 }
 0x1ad   :  { %v1056_v50 = vpop.f32.mrf.mxu1  ;;  %v1097_v41 = vpop.f32.mrf.mxu2  ;;  %v1168_v47 = vadd.f32 %v1167_v1, %v1123_v44 }
 0x1ae   :  { %v1057_v6 = vadd.f32 %v1056_v50, %v1014_v31 }
 0x1b0   :  { %v1098_v12 = vadd.f32 %v1097_v41, %v1057_v6 }
 0x1b2   :  { %v1141_v15 = vadd.f32 %v1140_v40, %v1098_v12 }
 0x1b4   :  { %v1171_v48 = vpop.f32.mrf.mxu0  ;;  %v1296_v28 = vpop.f32.mrf.mxu3 }
 0x1b5   :  { %v1202_v51 = vpop.f32.mrf.mxu1  ;;  %v1241_v52 = vpop.f32.mrf.mxu2  ;;  %v1172_v11 = vadd.f32 %v1171_v48, %v1129_v57 }
 0x1b6   :  { %v1203_v56 = vadd.f32 %v1202_v51, %v1168_v47  ;;  %v1242_v54 = vadd.f32 %v1241_v52, %v2044_v45 }
 0x1b8   :  { %1470 = vst [vmem:[#allocation3 + $0x40] sm:$0xff] %v1203_v56  ;;  %v1297_v23 = vadd.f32 %v1296_v28, %v1242_v54 }
 0x1bc   :  { %v1175_v59 = vpop.f32.mrf.mxu0  ;;  %v1300_v46 = vpop.f32.mrf.mxu3 }
 0x1bd   :  { %v1206_v14 = vpop.f32.mrf.mxu1  ;;  %v1249_v60 = vpop.f32.mrf.mxu2  ;;  %v1176_v7 = vadd.f32 %v1175_v59, %v1135_v4 }
 0x1be   :  { %v1207_v0 = vadd.f32 %v1206_v14, %v1172_v11  ;;  %v1250_v33 = vadd.f32 %v1249_v60, %v2051_v62 }
 0x1c0   :  { %1472 = vst [vmem:[#allocation3 + $0x50] sm:$0xff] %v1207_v0  ;;  %v1301_v25 = vadd.f32 %v1300_v46, %v1250_v33 }
 0x1c4   :  { %v1179_v9 = vpop.f32.mrf.mxu0  ;;  %v1304_v10 = vpop.f32.mrf.mxu3 }
 0x1c5   :  { %v1210_v5 = vpop.f32.mrf.mxu1  ;;  %v1257_v55 = vpop.f32.mrf.mxu2  ;;  %v1180_v16 = vadd.f32 %v1179_v9, %v1141_v15 }
 0x1c6   :  { %v1211_v13 = vadd.f32 %v1210_v5, %v1176_v7  ;;  %v1258_v45 = vadd.f32 %v1257_v55, %v2058_v42 }
 0x1c8   :  { %1474 = vst [vmem:[#allocation3 + $0x60] sm:$0xff] %v1211_v13  ;;  %v1305_v40 = vadd.f32 %v1304_v10, %v1258_v45 }
 0x1cc   :  { %v1334_v17 = vpop.f32.mrf.mxu0  ;;  %v1308_v63 = vpop.f32.mrf.mxu3 }
 0x1cd   :  { %v1214_v8 = vpop.f32.mrf.mxu1  ;;  %v1265_v3 = vpop.f32.mrf.mxu2  ;;  %v1335_v27 = vadd.f32 %v1334_v17, %v1297_v23 }
 0x1ce   :  { %v1215_v22 = vadd.f32 %v1214_v8, %v1180_v16  ;;  %v1266_v44 = vadd.f32 %v1265_v3, %v2065_v19 }
 0x1d0   :  { %1476 = vst [vmem:[#allocation3 + $0x70] sm:$0xff] %v1215_v22  ;;  %v1309_v28 = vadd.f32 %v1308_v63, %v1266_v44 }
 0x1d4   :  { %v1339_v2 = vpop.f32.mrf.mxu0  ;;  %v1454_v18 = vpop.f32.mrf.mxu3 }
 0x1d5   :  { %v1374_v26 = vpop.f32.mrf.mxu1  ;;  %v1419_v34 = vpop.f32.mrf.mxu2  ;;  %v1340_v36 = vadd.f32 %v1339_v2, %v1301_v25 }
 0x1d6   :  { %v1375_v20 = vadd.f32 %v1374_v26, %v1335_v27 }
 0x1d8   :  { %v1420_v21 = vadd.f32 %v1419_v34, %v1375_v20 }
 0x1da   :  { %v1455_v35 = vadd.f32 %v1454_v18, %v1420_v21 }
 0x1dc   :  { %1471 = vst [vmem:[#allocation3 + $0x48] sm:$0xff] %v1455_v35  ;;  %v1458_v37 = vpop.f32.mrf.mxu3  ;;  %v1344_v49 = vpop.f32.mrf.mxu0 }
 0x1dd   :  { %v1380_v38 = vpop.f32.mrf.mxu1  ;;  %v1423_v39 = vpop.f32.mrf.mxu2  ;;  %v1345_v41 = vadd.f32 %v1344_v49, %v1305_v40 }
 0x1de   :  { %v1381_v61 = vadd.f32 %v1380_v38, %v1340_v36 }
 0x1e0   :  { %v1424_v1 = vadd.f32 %v1423_v39, %v1381_v61 }
 0x1e2   :  { %v1459_v50 = vadd.f32 %v1458_v37, %v1424_v1 }
 0x1e4   :  { %1473 = vst [vmem:[#allocation3 + $0x58] sm:$0xff] %v1459_v50  ;;  %v1462_v29 = vpop.f32.mrf.mxu3  ;;  %v1349_v48 = vpop.f32.mrf.mxu0 }
 0x1e5   :  { %v1386_v62 = vpop.f32.mrf.mxu1  ;;  %v1427_v43 = vpop.f32.mrf.mxu2  ;;  %v1350_v52 = vadd.f32 %v1349_v48, %v1309_v28 }
 0x1e6   :  { %v1387_v24 = vadd.f32 %v1386_v62, %v1345_v41 }
 0x1e8   :  { %v1428_v47 = vadd.f32 %v1427_v43, %v1387_v24 }
 0x1ea   :  { %v1463_v51 = vadd.f32 %v1462_v29, %v1428_v47 }
 0x1ec   :  { %1475 = vst [vmem:[#allocation3 + $0x68] sm:$0xff] %v1463_v51  ;;  %v1466_v56 = vpop.f32.mrf.mxu3 }
 0x1ed   :  { %v1392_v42 = vpop.f32.mrf.mxu1  ;;  %v1431_v53 = vpop.f32.mrf.mxu2 }
 0x1ee   :  { %v1393_v32 = vadd.f32 %v1392_v42, %v1350_v52 }
 0x1f0   :  { %v1432_v57 = vadd.f32 %v1431_v53, %v1393_v32 }
 0x1f2   :  { %v1467_v19 = vadd.f32 %v1466_v56, %v1432_v57 }
 0x1f4   :  { %1477 = vst [vmem:[#allocation3 + $0x78] sm:$0xff] %v1467_v19 }
 0x1f5   :  { %1490 = dma.vmem_to_hbm [thread:$0]  %s1483_s18, 2048, %s1485_s20, [#allocation4], %s1556_s21, %s1556_s21, %s1557_s24  }
 0x1f6   :  { %1544 = dma.done.wait [#allocation4], 2048  }
 0x1f7   :  { %1545 = vsyncadd [#allocation4], 4294965248 }
 0x1f8   :  { %1495 = vsyncpa [#allocation4], 1 }

</bundles_post_ra>
